<compile_context>
chip_gen: v7x
topology: tpu7x:2x2x1
jax: 0.10.0
libtpu: 0.0.40
codegen_flags: <defaults>
</compile_context>

<pallas_src>
import functools
import math

import jax
import jax.numpy as jnp
import numpy as np
from jax.experimental import pallas as pl
from jax.experimental.pallas import tpu as pltpu


def _pick_tile(dim, target):
    """Largest multiple of 8 that divides `dim` and is <= target, else `dim`."""
    best = None
    for t in range(8, min(dim, target) + 1, 8):
        if dim % t == 0:
            best = t
    return best if best is not None else dim


# --------------------------------------------------------------------------
# Linear layers (token-tiled GEMM with resident weight)
# --------------------------------------------------------------------------

def _linear_bias_kernel(x_ref, w_ref, b_ref, o_ref):
    acc = jnp.dot(x_ref[...].astype(jnp.bfloat16),
                  w_ref[...].astype(jnp.bfloat16),
                  preferred_element_type=jnp.float32)
    o_ref[...] = (acc + b_ref[...]).astype(o_ref.dtype)


def _linear_nobias_kernel(x_ref, w_ref, o_ref):
    acc = jnp.dot(x_ref[...].astype(jnp.bfloat16),
                  w_ref[...].astype(jnp.bfloat16),
                  preferred_element_type=jnp.float32)
    o_ref[...] = acc.astype(o_ref.dtype)


def pallas_linear(x, w, b=None, *, out_dtype=None, tm_target=512):
    """x @ w (+ b) with x:(M,K), w:(K,N) (bf16), b:(1,N) f32 or None."""
    M, K = x.shape
    K2, N = w.shape
    assert K == K2
    out_dtype = x.dtype if out_dtype is None else out_dtype

    # Tile M; aim for >=2 grid steps (pipelining + both v7x TensorCores).
    tm = _pick_tile(M, min(tm_target, max(8, M // 2)))

    in_specs = [pl.BlockSpec((tm, K), lambda i: (i, 0)),   # activations: tiled
                pl.BlockSpec((K, N), lambda i: (0, 0))]    # weight: resident
    args = [x, w]
    if b is not None:
        in_specs.append(pl.BlockSpec((1, N), lambda i: (0, 0)))
        args.append(b)
        kernel = _linear_bias_kernel
    else:
        kernel = _linear_nobias_kernel

    return pl.pallas_call(
        kernel,
        out_shape=jax.ShapeDtypeStruct((M, N), out_dtype),
        grid=(M // tm,),
        in_specs=in_specs,
        out_specs=pl.BlockSpec((tm, N), lambda i: (i, 0)),
        compiler_params=pltpu.CompilerParams(
            dimension_semantics=("parallel",)),
    )(*args)


# --------------------------------------------------------------------------
# Linear (softmax-free) joint time-space attention
# --------------------------------------------------------------------------

def _attn_kv_kernel(k_ref, v_ref, kv_ref, ksum_ref, *, num_heads, scale):
    """Phase 1: accumulate kv = k^T v (per head) and k_sum over L tiles."""
    @pl.when(pl.program_id(1) == 0)
    def _():
        kv_ref[...] = jnp.zeros_like(kv_ref)
        ksum_ref[...] = jnp.zeros_like(ksum_ref)

    k = jnp.maximum(k_ref[...].astype(jnp.float32), 0.0) + scale   # (tl, C) f32
    v = v_ref[...].astype(jnp.bfloat16)                            # (tl, C)

    # k_sum accumulated in f32 (normalizer precision for large L).
    ksum_ref[...] += jnp.sum(k, axis=0, keepdims=True)

    e = k.shape[-1] // num_heads
    k_bf = k.astype(jnp.bfloat16)
    for h in range(num_heads):
        kh = k_bf[:, h * e:(h + 1) * e]                            # (tl, e)
        vh = v[:, h * e:(h + 1) * e]                               # (tl, e)
        # Contract over the token axis of both operands -- no explicit k.T.
        kv_ref[h] += jax.lax.dot_general(
            kh, vh, dimension_numbers=(((0,), (0,)), ((), ())),
            preferred_element_type=jnp.float32)


def _attn_out_kernel(q_ref, kv_ref, ksum_ref, o_ref, *, num_heads, scale, eps):
    """Phase 2: out = (q @ kv) * 1/(q . k_sum + eps), lane-dense (tl, C) store."""
    q = jnp.maximum(q_ref[...].astype(jnp.float32), 0.0) + scale   # (tl, C) f32
    q_bf = q.astype(jnp.bfloat16)
    ksum = ksum_ref[...]                                           # (1, C) f32

    e = q.shape[-1] // num_heads
    outs = []
    for h in range(num_heads):
        sl = slice(h * e, (h + 1) * e)
        num_h = jnp.dot(q_bf[:, sl], kv_ref[h].astype(jnp.bfloat16),
                        preferred_element_type=jnp.float32)        # (tl, e)
        denom = jnp.sum(q[:, sl] * ksum[:, sl], axis=-1, keepdims=True) + eps
        z = pl.reciprocal(denom, approx=True)                      # EUP slot
        outs.append(num_h * z)
    o_ref[...] = jnp.concatenate(outs, axis=-1).astype(o_ref.dtype)


def pallas_linear_attention(qkv, batch, num_frames, n_tokens, dim, num_heads,
                            scale, eps=1e-6, tl_target=512):
    """qkv: (B*N, 3*dim) fused projection output, rows ordered (batch, frame, n).

    Returns (batch, L, dim) with L = num_frames * n_tokens, head-major channels
    — i.e. exactly the '(b f) n (h e)' layout after a free reshape.
    """
    L = num_frames * n_tokens
    e = dim // num_heads
    tl = _pick_tile(L, min(tl_target, max(8, L // 2)))
    n_lt = L // tl

    if dim % 128 == 0:
        # Lane-dense fast path: select the q/k/v planes straight out of the
        # (b, L, 3*dim) slab via the BlockSpec index_map (block index 0/1/2
        # along the last axis) -- zero host-side relayout.
        qkv3 = qkv.reshape(batch, L, 3 * dim)
        arrs = (qkv3, qkv3, qkv3)
        planes = (0, 1, 2)
    else:
        # Fallback when dim is not a multiple of 128 (lane-block constraint).
        qkv4 = qkv.reshape(batch, L, 3, dim)
        arrs = tuple(qkv4[:, :, i] for i in range(3))
        planes = (0, 0, 0)

    def tok_spec(plane):
        return pl.BlockSpec((None, tl, dim),
                            lambda bi, li, p=plane: (bi, li, p))

    kv_spec = pl.BlockSpec((None, num_heads, e, e), lambda bi, li: (bi, 0, 0, 0))
    ks_spec = pl.BlockSpec((None, 1, dim), lambda bi, li: (bi, 0, 0))

    # Phase 1: reduce over L tiles (L axis last, "arbitrary"); accumulators live
    # in the resident output blocks.
    kv, ksum = pl.pallas_call(
        functools.partial(_attn_kv_kernel, num_heads=num_heads, scale=scale),
        out_shape=(jax.ShapeDtypeStruct((batch, num_heads, e, e), jnp.float32),
                   jax.ShapeDtypeStruct((batch, 1, dim), jnp.float32)),
        grid=(batch, n_lt),
        in_specs=[tok_spec(planes[1]), tok_spec(planes[2])],
        out_specs=(kv_spec, ks_spec),
        compiler_params=pltpu.CompilerParams(
            dimension_semantics=("parallel", "arbitrary")),
    )(arrs[1], arrs[2])

    # Phase 2: independent L tiles (both axes parallel -> both v7x TCs usable).
    out = pl.pallas_call(
        functools.partial(_attn_out_kernel, num_heads=num_heads,
                          scale=scale, eps=eps),
        out_shape=jax.ShapeDtypeStruct((batch, L, dim), qkv.dtype),
        grid=(batch, n_lt),
        in_specs=[tok_spec(planes[0]), kv_spec, ks_spec],
        out_specs=pl.BlockSpec((None, tl, dim), lambda bi, li: (bi, li, 0)),
        compiler_params=pltpu.CompilerParams(
            dimension_semantics=("parallel", "parallel")),
    )(arrs[0], kv, ksum)

    return out


# --------------------------------------------------------------------------
# Forward pass
# --------------------------------------------------------------------------

def linear_joint_ts_attention(x, num_frames, params):
    """x: (B, N, C) with B = batch * num_frames (channels-last, like torch)."""
    B, N, C = x.shape
    h = params["num_heads"]
    e = C // h
    b = B // num_frames
    scale = e ** (-0.5)

    # TODO(synk): insert_control_point (Temporal/SpatialShift) and use_orpe
    # (Orpe) branches are not implemented; attn_drop/proj_drop are identity at
    # p=0 in the default config.

    # qkv = nn.Linear(dim, 3*dim, bias=False); bf16 output feeds the MXU.
    qkv = pallas_linear(x.reshape(B * N, C), params["w_qkv"],
                        out_dtype=jnp.bfloat16)                        # (B*N, 3C)

    attn = pallas_linear_attention(qkv, b, num_frames, N, C, h, scale)  # (b, L, C)

    # (b, f*N, C) -> (B*N, C) is a contiguous (free) reshape into the proj GEMM.
    out = pallas_linear(attn.reshape(B * N, C), params["w_proj"],
                        params["b_proj"], out_dtype=x.dtype)
    return out.reshape(B, N, C)


# --------------------------------------------------------------------------
# Pure-JAX f32 reference (same math) for a sanity check
# --------------------------------------------------------------------------

def reference(x, num_frames, params):
    B, N, C = x.shape
    h = params["num_heads"]
    e = C // h
    b = B // num_frames
    scale = e ** (-0.5)
    eps = 1e-6
    w_qkv = params["w_qkv"].astype(jnp.float32)
    w_proj = params["w_proj"].astype(jnp.float32)

    qkv = x.reshape(B * N, C) @ w_qkv
    qkv = qkv.reshape(B, N, 3, h, e)
    q, k, v = qkv[:, :, 0], qkv[:, :, 1], qkv[:, :, 2]

    q_ = jnp.maximum(q, 0.0) + scale
    k_ = jnp.maximum(k, 0.0) + scale

    def merge(t):
        return t.reshape(b, num_frames * N, h, e)

    q_, k_, v_ = merge(q_), merge(k_), merge(v)           # (b, L, h, e)

    kv = jnp.einsum("blhe,blhd->bhed", k_, v_)            # (b, h, e, e)
    k_sum = jnp.sum(k_, axis=1, keepdims=True)            # (b, 1, h, e)
    z = 1.0 / (jnp.sum(q_ * k_sum, axis=-1) + eps)        # (b, L, h)
    out = jnp.einsum("blhe,bhed->blhd", q_, kv) * z[..., None]
    out = out.reshape(B, N, C)
    return (out.reshape(B * N, C) @ w_proj
            + params["b_proj"]).reshape(B, N, C)


# --------------------------------------------------------------------------

if __name__ == "__main__":
    # Small config consistent with the module:
    # batch=2, frames=2 -> B=4 ; N=16 (4x4 patches); dim=128 ; heads=4 -> e=32.
    batch, num_frames, N, C, num_heads = 2, 2, 16, 128, 4
    B = batch * num_frames

    key = jax.random.PRNGKey(0)
    kx, kw1, kw2, kb2 = jax.random.split(key, 4)

    x = jax.random.normal(kx, (B, N, C), jnp.float32)

    params = {
        "num_heads": num_heads,
        # nn.Linear(dim, 3*dim, bias=False) -- stored (in, out), bf16
        "w_qkv": (jax.random.normal(kw1, (C, 3 * C), jnp.float32)
                  * (1.0 / math.sqrt(C))).astype(jnp.bfloat16),
        # nn.Linear(dim, dim) with bias -- weight bf16, bias f32
        "w_proj": (jax.random.normal(kw2, (C, C), jnp.float32)
                   * (1.0 / math.sqrt(C))).astype(jnp.bfloat16),
        "b_proj": jax.random.normal(kb2, (1, C), jnp.float32) * 0.02,
    }

    out = jax.block_until_ready(linear_joint_ts_attention(x, num_frames, params))
    ref = jax.block_until_ready(reference(x, num_frames, params))

    np.testing.assert_allclose(np.asarray(out, dtype=np.float32),
                               np.asarray(ref, dtype=np.float32),
                               rtol=3e-2, atol=1e-2)

    print("KERNEL_OK")
</pallas_src>

<mosaic_0001>
module attributes {stable_mosaic.version = 11 : i64} {
  func.func @_linear_nobias_kernel(%arg0: i32, %arg1: memref<32x128xf32, #tpu.memory_space<vmem>>, %arg2: memref<128x384xbf16, #tpu.memory_space<vmem>>, %arg3: memref<32x384xbf16, #tpu.memory_space<vmem>>) attributes {dimension_semantics = [#tpu.dimension_semantics<parallel>], iteration_bounds = array<i64: 2>, scalar_prefetch = 0 : i64, scratch_operands = 0 : i64, tpu.core_type = #tpu.core_type<tc>, window_params = [{transform_indices = @transform_0, window_bounds = array<i64: 32, 128>}, {pipeline_mode = #tpu.pipeline_mode<synchronous>, transform_indices = @transform_1, window_bounds = array<i64: 128, 384>}, {transform_indices = @transform_2, window_bounds = array<i64: 32, 384>}]} {
    %c0 = arith.constant 0 : index
    %c0_0 = arith.constant 0 : index
    %0 = vector.load %arg1[%c0, %c0_0] : memref<32x128xf32, #tpu.memory_space<vmem>>, vector<32x128xf32>
    %1 = arith.truncf %0 : vector<32x128xf32> to vector<32x128xbf16>
    %c0_1 = arith.constant 0 : index
    %c0_2 = arith.constant 0 : index
    %2 = vector.load %arg2[%c0_1, %c0_2] : memref<128x384xbf16, #tpu.memory_space<vmem>>, vector<128x384xbf16>
    %cst = arith.constant dense<0.000000e+00> : vector<32x384xf32>
    %3 = tpu.matmul %1, %2, %cst {dimension_numbers = #tpu.dot_dimension_numbers<[1], [0], [0], [1], [0, 0, 1, 1], [], []>} : vector<32x128xbf16>, vector<128x384xbf16>, vector<32x384xf32> -> vector<32x384xf32>
    %4 = arith.truncf %3 : vector<32x384xf32> to vector<32x384xbf16>
    %c0_3 = arith.constant 0 : index
    %c0_4 = arith.constant 0 : index
    %5 = vector.load %arg3[%c0_3, %c0_4] : memref<32x384xbf16, #tpu.memory_space<vmem>>, vector<32x384xbf16>
    tpu.vector_store %arg3[%c0_3, %c0_4], %4 {strides = array<i32>} : memref<32x384xbf16, #tpu.memory_space<vmem>>, vector<32x384xbf16>,
    return
  }
  func.func @transform_0(%arg0: i32) -> (i32, i32) {
    %c0_i32 = arith.constant 0 : i32
    %c0_i32_0 = arith.constant 0 : i32
    return %arg0, %c0_i32 : i32, i32
  }
  func.func @transform_1(%arg0: i32) -> (i32, i32) {
    %c0_i32 = arith.constant 0 : i32
    %c0_i32_0 = arith.constant 0 : i32
    %c0_i32_1 = arith.constant 0 : i32
    return %c0_i32, %c0_i32_0 : i32, i32
  }
  func.func @transform_2(%arg0: i32) -> (i32, i32) {
    %c0_i32 = arith.constant 0 : i32
    %c0_i32_0 = arith.constant 0 : i32
    return %arg0, %c0_i32 : i32, i32
  }
}

</mosaic_0001>

<bundles_post_ra>
// kernel: tpu_custom_call.1
= control target key start
LH: loop header
LB: loop body
LE: loop exit
PB: predicated region body
PF: predicated region fallthrough
CT: control target
= control target key end

     0   :  { %7 = vsyncpa [#allocation3], 0  ;;  %s1143_s0 = inlined_call_operand.hbm [shape: f32[64,128], index: 0, kind: input, shape index: {}]   ;;  %s1144_s1 = inlined_call_operand.hbm [shape: bf16[128,384], index: 1, kind: input, shape index: {}]   ;;  %s1145_s2 = inlined_call_operand.hbm [shape: bf16[64,384], index: 2, kind: output, shape index: {}]  }
   0x1   :  { %9 = vsyncpa [#allocation3 + $0x1], 0 }
   0x2   :  { %10 = vsyncpa [#allocation6], 0 }
   0x3   :  { %11 = vsyncpa [#allocation4], 0 }
   0x4   :  { %13 = vsyncpa [#allocation4 + $0x1], 0  ;;  %s933_s9 = smov 0   ;;  %s935_s10 = smov 0  }
   0x5   :  { %s937_s11 = smov 0   ;;  %s939_s12 = smov 0  }
   0x6 LB: > { %s954_s13 = sadd.s32 4294967295, %s906_s12   ;;  %s594_s14 = sadd.s32 4294967294, %s906_s12   ;;  %s906_s12 = sphi %s939_s12, %s1165_s12   ;;  %s902_s11 = sphi %s937_s11, %s1164_s11   ;;  %s898_s10 = sphi %s935_s10, %s1163_s10   ;;  %s894_s9 = sphi %s933_s9, %s1162_s9  }
   0x7   : > { %p39_p0 = scmp.ne.s32.totalorder %s898_s10, %s894_s9  ;;  %p1146_p1 = scmp.eq.s32.totalorder %s954_s13, 0 }
   0x8   : > { %p90_p3 = scmp.eq.s32.totalorder %s594_s14, 1  ;;  %p595_p5 = scmp.ge.s32.totalorder %s906_s12, 1 }
   0x9   : > { %p963_p4 = por %p1146_p1, %p39_p0  ;;  %p97_p7 = scmp.lt.s32.totalorder %s906_s12, 3 }
   0xa   : > { %p968_p6 = por %p90_p3, %p39_p0  ;;  %s908_s18 = smov [#allocation5]  }
   0xb   : > { %s1149_s15 = scalar_select %p963_p4, 1, 0 }
   0xc   : > { %s1150_s16 = scalar_select %p968_p6, 1, 0 }
   0xd   : > { %p973_p8 = pnand %p595_p5, %p97_p7  ;;  %s109_s19 = sshll.u32 %s908_s18, 4  ;;  %s977_s19 = int_to_ptr.vmem [resolvable:$true] %s109_s19 }
   0xe   : > { %s989_s21 = sadd.s32 1, %s906_s12   ;;  %s26_s22 = sadd.s32 1, %s902_s11 }
   0xf   : > { %s1151_s17 = scalar_select %p973_p8, 1, 0 }
  0x10   : > { %p690_p9 = pneg %p973_p8  ;;  %s23_s23 = ssub.s32 %s906_s12, %s989_s21 }
  0x11   : > { %s778_s26 = scalar_lea.hbm %s1144_s1, 3072 }
  0x12   : > { %p984_p11 = pnand %p690_p9, %p1146_p1  ;;  %p779_p12 = scmp.ne.s32.totalorder %s1144_s1, %s778_s26 }
  0x13   : > { %p785_p5 = scmp.lt.u32.totalorder %s778_s26, %s1144_s1 }
  0x14   : > { %p780_p13 = pneg %p984_p11 }
  0x16   : > { %p781_p0 = pnand %p780_p13, %p779_p12 }
  0x18   : > { %p782_p3 = pneg %p781_p0 }
  0x1a   : > { %p787_p7 = pnand %p785_p5, %p782_p3 }
  0x1c   : > { %790 = shalt.err (!%p787_p7)
}
  0x1d   : > { %s791_s3 = scalar_lea.vmem %s977_s19, 3072  ;;  %p799_p2 = scmp.lt.s32.totalorder %s977_s19, %s977_s19 }
  0x1e   : > { %p792_p9 = scmp.ne.s32.totalorder %s977_s19, %s791_s3  ;;  %p800_p6 = scmp.lt.s32.totalorder %s791_s3, %s791_s3 }
  0x20   : > { %p794_p10 = pnand %p792_p9, %p780_p13  ;;  %p801_p4 = por %p800_p6, %p799_p2 }
  0x22   : > { %p795_p1 = pneg %p794_p10 }
  0x24   : > { %p802_p8 = pnand %p801_p4, %p795_p1 }
  0x26   : > { %805 = shalt.err (!%p802_p8)
}
  0x27   : > { %s909_s4 = smov 192   ;;  %s910_s5 = smov 12  }
  0x28   : > { %693 = dma.hbm_to_vmem [thread:$0]  (!%p984_p11), %s1144_s1, 3072, %s977_s19, [#allocation6], %s909_s4, %s909_s4, %s910_s5  }
  0x29   : > { %p24_p2 = scmp.eq.s32.totalorder %s23_s23, 0  ;;  %p33_p1 = scmp.ne.s32.totalorder %s902_s11, %s898_s10 }
  0x2a   : > { %p34_p4 = scmp.eq.s32.totalorder %s906_s12, 0  ;;  %p703_p6 = scmp.lt.s32.totalorder %s906_s12, 2 }
  0x2b   : > { %s1020_s8 = scalar_select %p24_p2, %s902_s11, %s26_s22  }
  0x2c   : > { %p35_p8 = por %p34_p4, %p33_p1  ;;  %p1153_p10 = scmp.eq.s32.totalorder %s954_s13, 1 }
  0x2d   : > { %s123_s18 = sand.u32 1, %s902_s11   ;;  %s641_s24 = sshll.u32 %s906_s12, 9 }
  0x2e   : > { %p1024_p12 = por %p1153_p10, %p33_p1  ;;  %s598_s25 = sshll.u32 %s123_s18, 5 }
  0x2f   : > { %s1033_s27 = scalar_lea.hbm %s1143_s0, %s641_s24  ;;  %s127_s19 = scalar_lea.vmem [#allocation2], %s598_s25 }
  0x30   : > { %s134_s22 = sshll.u32 %s127_s19, 4  ;;  %p1035_p11 = pnand %p703_p6, %p35_p8  ;;  %s1039_s22 = int_to_ptr.vmem [resolvable:$true] %s134_s22 }
  0x31   : > { %s1041_s28 = scalar_lea.sflag [#allocation3], %s123_s18  ;;  %s806_s29 = scalar_lea.hbm %s1033_s27, 512 }
  0x32   : > { %p807_p13 = scmp.ne.s32.totalorder %s1033_s27, %s806_s29  ;;  %p808_p0 = pneg %p1035_p11 }
  0x33   : > { %s811_s4 = scalar_lea.hbm %s1143_s0, 1024  ;;  %p812_p7 = scmp.lt.u32.totalorder %s1033_s27, %s1143_s0 }
  0x34   : > { %p809_p3 = pnand %p808_p0, %p807_p13  ;;  %p813_p9 = scmp.lt.u32.totalorder %s811_s4, %s806_s29 }
  0x35   : > { %p815_p1 = scmp.lt.u32.totalorder %s806_s29, %s1033_s27 }
  0x36   : > { %p810_p5 = pneg %p809_p3  ;;  %p814_p2 = por %p813_p9, %p812_p7 }
  0x38   : > { %p816_p4 = por %p815_p1, %p814_p2 }
  0x3a   : > { %p817_p6 = pnand %p816_p4, %p810_p5 }
  0x3c   : > { %820 = shalt.err (!%p817_p6)
}
  0x3d   : > { %s821_s7 = scalar_lea.vmem %s1039_s22, 512  ;;  %s911_s18 = smov [#allocation2]  }
  0x3e   : > { %p822_p8 = scmp.ne.s32.totalorder %s1039_s22, %s821_s7  ;;  %s826_s24 = sshll.u32 %s911_s18, 4  ;;  %s827_s24 = int_to_ptr.vmem [resolvable:$false] %s826_s24 }
  0x3f   : > { %s828_s25 = scalar_lea.vmem %s827_s24, 1024  ;;  %p829_p3 = scmp.lt.s32.totalorder %s1039_s22, %s827_s24 }
  0x40   : > { %p824_p10 = pnand %p822_p8, %p808_p0  ;;  %p830_p7 = scmp.lt.s32.totalorder %s828_s25, %s821_s7 }
  0x42   : > { %p825_p13 = pneg %p824_p10  ;;  %p831_p9 = por %p830_p7, %p829_p3 }
  0x44   : > { %p832_p2 = pnand %p831_p9, %p825_p13 }
  0x46   : > { %835 = shalt.err (!%p832_p2)
}
  0x47   : > { %s912_s20 = smov 128   ;;  %s913_s26 = smov 8  }
  0x48   : > { %697 = dma.hbm_to_vmem [thread:$0]  (!%p1035_p11), %s1033_s27, 512, %s1039_s22, %s1041_s28, %s912_s20, %s912_s20, %s913_s26  }
  0x49   : > { %p1156_p0 = scmp.ne.s32.totalorder %s1151_s17, 0 }
  0x4a   : > { %s1072_s19 = sand.u32 (!%p1156_p0), 1, %s898_s10   ;;  %p1157_p5 = scmp.ne.s32.totalorder (!%p1156_p0), %s1149_s15, 0 }
  0x4b   : > { %146 = sbr.rel (%p1156_p0) target bundleno = 359 (0x167), region = 28  ;;  %s602_s29 = sshll.u32 (!%p1156_p0), %s1072_s19, 5 }
  0x4c   : > { %s149_s30 = scalar_lea.sflag (!%p1156_p0), [#allocation3], %s1072_s19  ;;  %s1076_s3 = scalar_lea.vmem (!%p1156_p0), [#allocation2], %s602_s29 }
  0x52   : > { %881 = dma.done.wait (%p1157_p5), %s149_s30, 512  }
  0x53   : > { %883 = vsyncadd (%p1157_p5), %s149_s30, 4294966784  ;;  %p1158_p11 = scmp.eq.s32.totalorder %s954_s13, 0 }
  0x55   : > { %885 = dma.done.wait (%p1158_p11), [#allocation6], 3072   ;;  %p1159_p1 = pmov %p1158_p11 }
  0x56   : > { %v914_v0 = vmov 0   ;;  %v746_v1 = vld [vmem:[#allocation5 + $0x4] ss:$12 sps:$4 sm:$0xff]   ;;  %v748_v2 = vld [vmem:[#allocation5] ss:$12 sps:$4 sm:$0xff]   ;;  %v183_v29 = vld [vmem:[%s1076_s3 + $0x18] sm:$0xff] }
  0x57   : > { %887 = vsyncadd (%p1159_p1), [#allocation6], 4294964224  ;;  %378 = vmatprep.mubr.bf16.mxu0 %v914_v0  ;;  %346 = vmatprep.subr.bf16.mxu0 %v746_v1  ;;  %v749_v3 = vld [vmem:[#allocation5 + $0x1c] ss:$12 sps:$4 sm:$0xff]   ;;  %v751_v4 = vld [vmem:[#allocation5 + $0x18] ss:$12 sps:$4 sm:$0xff]  }
  0x58   : > { %347 = vmatpush1.bf16.msra.mxu0 %v748_v2  ;;  %v752_v5 = vld [vmem:[#allocation5 + $0x8] ss:$12 sps:$4 sm:$0xff]   ;;  %v756_v7 = vld [vmem:[#allocation5 + $0x20] ss:$12 sps:$4 sm:$0xff]   ;;  %v755_v8 = vld [vmem:[#allocation5 + $0x30] ss:$12 sps:$4 sm:$0xff]  }
  0x59   : > { %348 = vmatprep.subr.bf16.mxu0 %v749_v3  ;;  %v753_v6 = vld [vmem:[#allocation5 + $0x34] ss:$12 sps:$4 sm:$0xff]   ;;  %660 = vmatprep.subr.bf16.mxu1 %v752_v5  ;;  %v757_v9 = vld [vmem:[#allocation5 + $0x4c] ss:$12 sps:$4 sm:$0xff]   ;;  %v764_v12 = vld [vmem:[#allocation5 + $0x50] ss:$12 sps:$4 sm:$0xff]  }
  0x5a   : > { %661 = vmatpush3.bf16.msra.mxu1 %v752_v5  ;;  %v760_v10 = vld [vmem:[#allocation5 + $0x38] ss:$12 sps:$4 sm:$0xff]   ;;  %v759_v11 = vld [vmem:[#allocation5 + $0x48] ss:$12 sps:$4 sm:$0xff]   ;;  %v763_v14 = vld [vmem:[#allocation5 + $0x60] ss:$12 sps:$4 sm:$0xff]  }
  0x5b   : > { %662 = vmatprep.subr.bf16.mxu1 %v756_v7  ;;  %v761_v13 = vld [vmem:[#allocation5 + $0x64] ss:$12 sps:$4 sm:$0xff]   ;;  %v768_v15 = vld [vmem:[#allocation5 + $0x68] ss:$12 sps:$4 sm:$0xff]   ;;  %v772_v20 = vld [vmem:[#allocation5 + $0x80] ss:$12 sps:$4 sm:$0xff]  }
  0x5c   : > { %349 = vmatpush1.bf16.msra.mxu0 %v751_v4  ;;  %v765_v16 = vld [vmem:[#allocation5 + $0x7c] ss:$12 sps:$4 sm:$0xff]   ;;  %v180_v17 = vld [vmem:[%s1076_s3] sm:$0xff]  ;;  %v773_v25 = vld [vmem:[#allocation5 + $0xac] ss:$12 sps:$4 sm:$0xff]   ;;  %s680_s15 = smul.u32 48, %s1072_s19 }
  0x5d   : > { %350 = vmatprep.subr.bf16.mxu0 %v753_v6  ;;  %v181_v18 = vld [vmem:[%s1076_s3 + $0x8] sm:$0xff]  ;;  %v767_v19 = vld [vmem:[#allocation5 + $0x78] ss:$12 sps:$4 sm:$0xff]   ;;  %v769_v22 = vld [vmem:[#allocation5 + $0x94] ss:$12 sps:$4 sm:$0xff]   ;;  %s681_s22 = smul.u32 768, %s954_s13 }
  0x5e   : > { %663 = vmatpush3.bf16.msra.mxu1 %v756_v7  ;;  %v184_v21 = vpack.c.bf16 %v181_v18, %v180_v17  ;;  %v771_v23 = vld [vmem:[#allocation5 + $0x90] ss:$12 sps:$4 sm:$0xff]   ;;  %v776_v24 = vld [vmem:[#allocation5 + $0x98] ss:$12 sps:$4 sm:$0xff]   ;;  %v775_v26 = vld [vmem:[#allocation5 + $0xa8] ss:$12 sps:$4 sm:$0xff]  }
  0x5f   : > { %664 = vmatprep.subr.bf16.mxu1 %v760_v10  ;;  %v777_v27 = vld [vmem:[#allocation5 + $0xb0] ss:$12 sps:$4 sm:$0xff]   ;;  %s176_s17 = scalar_lea.vmem [#allocation7], %s680_s15  ;;  %s1099_s4 = scalar_lea.hbm %s1145_s2, %s681_s22 }
  0x60   : > { %351 = vmatpush1.bf16.msra.mxu0 %v755_v8  ;;  %676 = vmatprep.mubr.bf16.mxu1 %v184_v21  ;;  %v182_v28 = vld [vmem:[%s1076_s3 + $0x10] sm:$0xff]  ;;  %s511_s27 = sshll.u32 %s176_s17, 4  ;;  %s497_s13 = scalar_lea.sflag [#allocation4], %s1072_s19  ;;  %s1094_s27 = int_to_ptr.vmem [resolvable:$true] %s511_s27 }
  0x61   : > { %352 = vmatprep.subr.bf16.mxu0 %v757_v9  ;;  %v185_v30 = vpack.c.bf16 %v183_v29, %v182_v28  ;;  %s836_s5 = scalar_lea.vmem %s1094_s27, 768  ;;  %s915_s6 = smov [#allocation7]  }
  0x62   : > { %665 = vmatpush3.bf16.msra.mxu1 %v760_v10  ;;  %p837_p4 = scmp.ne.s32.totalorder %s1094_s27, %s836_s5  ;;  %s840_s7 = sshll.u32 %s915_s6, 4  ;;  %s841_s7 = int_to_ptr.vmem [resolvable:$false] %s840_s7 }
  0x63   : > { %666 = vmatprep.subr.bf16.mxu1 %v764_v12  ;;  %s842_s18 = scalar_lea.vmem %s841_s7, 1536  ;;  %p843_p10 = scmp.lt.s32.totalorder %s1094_s27, %s841_s7 }
  0x64   : > { %353 = vmatpush1.bf16.msra.mxu0 %v759_v11  ;;  %p838_p6 = pnand %p837_p4, %p1024_p12  ;;  %p844_p13 = scmp.lt.s32.totalorder %s842_s18, %s836_s5 }
  0x65   : > { %354 = vmatprep.subr.bf16.mxu0 %v761_v13 }
  0x66   : > { %667 = vmatpush3.bf16.msra.mxu1 %v764_v12  ;;  %p839_p8 = pneg %p838_p6  ;;  %p845_p3 = por %p844_p13, %p843_p10 }
  0x67   : > { %668 = vmatprep.subr.bf16.mxu1 %v768_v15 }
  0x68   : > { %355 = vmatpush1.bf16.msra.mxu0 %v763_v14  ;;  %p846_p7 = pnand %p845_p3, %p839_p8 }
  0x69   : > { %356 = vmatprep.subr.bf16.mxu0 %v765_v16 }
  0x6a   : > { %669 = vmatpush3.bf16.msra.mxu1 %v768_v15 }
  0x6b   : > { %670 = vmatprep.subr.bf16.mxu1 %v772_v20 }
  0x6c   : > { %357 = vmatpush1.bf16.msra.mxu0 %v767_v19 }
  0x6d   : > { %358 = vmatprep.subr.bf16.mxu0 %v769_v22 }
  0x6e   : > { %671 = vmatpush3.bf16.msra.mxu1 %v772_v20 }
  0x6f   : > { %672 = vmatprep.subr.bf16.mxu1 %v776_v24 }
  0x70   : > { %359 = vmatpush1.bf16.msra.mxu0 %v771_v23 }
  0x71   : > { %360 = vmatprep.subr.bf16.mxu0 %v773_v25 }
  0x72   : > { %673 = vmatpush3.bf16.msra.mxu1 %v776_v24 }
  0x73   : > { %674 = vmatprep.subr.bf16.mxu1 %v777_v27 }
  0x74   : > { %361 = vmatpush1.bf16.msra.mxu0 %v775_v26 }
  0x76   : > { %675 = vmatpush3.bf16.msra.mxu1 %v777_v27 }
  0x77   : > { %379 = vmatmul.mubr.bf16.vlgmr.msra.gmra.mrb[0].mxu0 %v184_v21 }
  0x78   : > { %388 = vmatprep.mubr.bf16.mxu0 %v914_v0 }
  0x79   : > { %677 = vmatmul.mubr.bf16.vlgmr.msra.gmra.mrb[0].mxu1 %v185_v30 }
  0x7f   : > { %389 = vmatmul.mubr.bf16.gmra.mrb[4].mxu0 %v185_v30 }
 0x14a   : > { %v380_v31 = vpop.f32.mrb[0].mxu0 }
 0x14b   : > { %v382_v32 = vpop.f32.mrb[1].mxu0 }
 0x14c   : > { %v642_v33 = vpack.c.bf16 %v382_v32, %v380_v31  ;;  %v384_v34 = vpop.f32.mrb[2].mxu0  ;;  %v678_v36 = vpop.f32.mrb[0].mxu1 }
 0x14d   : > { %v386_v35 = vpop.f32.mrb[3].mxu0  ;;  %v647_v38 = vpack.c.bf16 %v678_v36, %v678_v36  ;;  %v433_v39 = vpop.f32.mrb[1].mxu1 }
 0x14e   : > { %488 = vst [vmem:[%s176_s17] sm:$0xff] %v642_v33  ;;  %v644_v37 = vpack.c.bf16 %v386_v35, %v384_v34  ;;  %v643_v40 = vpack.c.bf16 %v433_v39, %v433_v39  ;;  %v679_v41 = vpop.f32.mrb[2].mxu1 }
 0x14f   : > { %493 = vst [vmem:[%s176_s17 + $0x20] sm:$0xf] %v647_v38  ;;  %v649_v42 = vpack.c.bf16 %v679_v41, %v679_v41  ;;  %v436_v43 = vpop.f32.mrb[3].mxu1 }
 0x150   : > { %490 = vst [vmem:[%s176_s17 + $0xc] sm:$0xff] %v644_v37  ;;  %489 = vst [vmem:[%s176_s17 + $0x8] sm:$0xf] %v643_v40  ;;  %v645_v44 = vpack.c.bf16 %v436_v43, %v436_v43 }
 0x151   : > { %495 = vst [vmem:[%s176_s17 + $0x2c] sm:$0xf] %v649_v42 }
 0x152   : > { %v390_v45 = vpop.f32.mrb[4].mxu0  ;;  %491 = vst [vmem:[%s176_s17 + $0x14] sm:$0xf] %v645_v44 }
 0x153   : > { %v392_v46 = vpop.f32.mrb[5].mxu0 }
 0x154   : > { %v646_v47 = vpack.c.bf16 %v392_v46, %v390_v45  ;;  %v394_v48 = vpop.f32.mrb[6].mxu0 }
 0x155   : > { %v396_v49 = vpop.f32.mrb[7].mxu0 }
 0x156   : > { %492 = vst [vmem:[%s176_s17 + $0x18] sm:$0xff] %v646_v47  ;;  %v648_v50 = vpack.c.bf16 %v396_v49, %v394_v48 }
 0x158   : > { %494 = vst [vmem:[%s176_s17 + $0x24] sm:$0xff] %v648_v50 }
 0x159   : > { %849 = shalt.err (!%p846_p7)
}
 0x15a   : > { %s850_s24 = scalar_lea.hbm %s1099_s4, 768  ;;  %s854_s26 = scalar_lea.hbm %s1145_s2, 1536 }
 0x15b   : > { %p851_p9 = scmp.ne.s32.totalorder %s1099_s4, %s850_s24  ;;  %p855_p5 = scmp.lt.u32.totalorder %s1099_s4, %s1145_s2 }
 0x15c   : > { %p856_p11 = scmp.lt.u32.totalorder %s854_s26, %s850_s24  ;;  %p858_p4 = scmp.lt.u32.totalorder %s850_s24, %s1099_s4 }
 0x15d   : > { %p852_p2 = pnand %p851_p9, %p1024_p12 }
 0x15e   : > { %p857_p1 = por %p856_p11, %p855_p5 }
 0x15f   : > { %p853_p0 = pneg %p852_p2 }
 0x160   : > { %p859_p6 = por %p858_p4, %p857_p1 }
 0x162   : > { %p860_p8 = pnand %p859_p6, %p853_p0 }
 0x164   : > { %863 = shalt.err (!%p860_p8)
}
 0x165   : > { %s916_s3 = smov 192   ;;  %s917_s15 = smov 12  }
 0x166   : > { %688 = dma.vmem_to_hbm [thread:$0]  (%p1024_p12), %s1094_s27, 768, %s1099_s4, %s497_s13, %s916_s3, %s916_s3, %s917_s15  }
 0x167 PF: > { %s526_s17 = sand.u32 1, %s894_s9   ;;  %p1160_p10 = scmp.ne.s32.totalorder %s1150_s16, 0 }
 0x168   : > { %p1161_p13 = scmp.ge.s32.totalorder %s906_s12, 2  ;;  %s527_s22 = scalar_lea.sflag [#allocation4], %s526_s17 }
 0x16a   : > { %p699_p3 = pnand %p1161_p13, %p1160_p10 }
 0x16c   : > { %889 = dma.done.wait (!%p699_p3), %s527_s22, 768  }
 0x16d   : > { %891 = vsyncadd (!%p699_p3), %s527_s22, 4294966528  ;;  %p16_p7 = scmp.ge.s32.totalorder %s989_s21, 4   ;;  %s1162_s9 = smov %s898_s10 }
 0x16e   : > { %s1163_s10 = smov %s902_s11  ;;  %s1164_s11 = smov %s1020_s8 }
 0x16f   : > { %s1165_s12 = smov %s989_s21  ;;  %18 = sbr.rel (!%p16_p7) target bundleno = 6 (0x6), region = 77 }
 0x176   :  { %532 = vsyncpa [#allocation3], 1 }
 0x177   :  { %534 = vsyncpa [#allocation3 + $0x1], 1 }
 0x178   :  { %535 = vsyncpa [#allocation6], 1 }
 0x179   :  { %536 = vsyncpa [#allocation4], 1 }
 0x17a   :  { %538 = vsyncpa [#allocation4 + $0x1], 1 }

</bundles_post_ra>
